<compile_context>
chip_gen: v7x
topology: tpu7x:2x2x1
jax: 0.10.0
libtpu: 0.0.40
codegen_flags: <defaults>
</compile_context>

<pallas_src>
import functools

import jax
import jax.numpy as jnp
from jax.experimental import pallas as pl
from jax.experimental.pallas import tpu as pltpu


def _cdiv(a: int, b: int) -> int:
    return -(-a // b)


def _gconv_kernel(x_ref, adj_ref, w_ref, b_ref, out_ref, *,
                  norm: bool, d_pad: int, out_cols: int, mxu_bf16: bool):
    # Block shapes: x (bt, N, D_in), adj (bt, N, N), w (D_in, 2*d_pad),
    # b (1, 2*d_pad), out (bt, N, out_cols).
    bt, n, d_in = x_ref.shape
    mxu_dtype = jnp.bfloat16 if mxu_bf16 else jnp.float32

    wm = w_ref[...].astype(mxu_dtype)          # no-op (weights pre-cast on host)
    bias = b_ref[...].astype(jnp.float32)      # (1, 2*d_pad)

    # Fused [Wa|Wu] linear. Flatten batch into the row dimension so one matmul
    # fills the MXU rows (bt*n instead of n) and weights are pushed once.
    if n % 8 == 0 or bt == 1:
        x2 = x_ref[...].reshape(bt * n, d_in).astype(mxu_dtype)   # single cast
        au = jnp.dot(x2, wm, preferred_element_type=jnp.float32)  # (bt*n, 2dp)
        au = jnp.maximum(au + bias, 0.0).reshape(bt, n, 2 * d_pad)
    else:
        au = jnp.einsum("bnd,de->bne", x_ref[...].astype(mxu_dtype), wm,
                        preferred_element_type=jnp.float32)
        au = jnp.maximum(au + bias, 0.0)
    ax = au[..., :d_pad]        # (bt, n, d_pad) -- 128-aligned static slices
    ux = au[..., d_pad:]        # (bt, n, d_pad)

    adjm = adj_ref[...]         # stored dtype; cast exactly once (below)
    if norm:
        # F.normalize(adj, p=1, dim=-2): the per-column scale rides the
        # contraction index m, so apply it to ax rows instead of rewriting the
        # (n, n) adjacency.  Work is an (bt, n) reciprocal + (bt, n, d_pad)
        # multiply instead of an (bt, n, n) multiply; adj stays untouched and a
        # {0,1} adjacency is losslessly castable to bf16 for the MXU.
        col_l1 = jnp.sum(jnp.abs(adjm), axis=-2, keepdims=True,
                         dtype=jnp.float32)                       # (bt, 1, n)
        inv = 1.0 / jnp.maximum(col_l1, 1e-12)                    # PyTorch eps
        ax = ax * jnp.swapaxes(inv, -1, -2)                       # (bt, n, 1)

    # Neighbour aggregation (batched MXU matmul, f32 accumulation) + self term.
    # TODO(synk): for tiny n (<= 32) pack several batches' adjacencies
    # block-diagonally into one 128/256-wide contraction tile to fill the MXU.
    agg = jnp.einsum("bnm,bme->bne",
                     adjm.astype(mxu_dtype), ax.astype(mxu_dtype),
                     preferred_element_type=jnp.float32)
    out_ref[...] = (agg + ux)[..., :out_cols].astype(out_ref.dtype)


def gconv_forward(x, adj, wa, ba, wu, bu, norm: bool = True,
                  mxu_bf16: bool = False):
    """x: (B, N, D_in), adj: (B, N, N). Weights wa/wu: (D_in, D_out),
    biases ba/bu: (D_out,). Returns (B, N, D_out) float32.

    mxu_bf16=True is the recommended perf mode (bf16 MXU operands, f32 accum);
    the {0,1} adjacency cast is exact, x/weight casts are lossy (~1e-2 abs)."""
    B, N, D_in = x.shape
    D_out = wa.shape[1]
    d_pad = _cdiv(D_out, 128) * 128

    # Lane-dense padded output only while the padded HBM writeback (plus the
    # post-call slice pass) stays within ~2x of the real output bytes;
    # otherwise store D_out directly and accept masked partial stores.
    pad_out = d_pad <= 2 * D_out
    out_cols = d_pad if pad_out else D_out

    # Zero-pad weights/biases to d_pad and fuse the two linear layers. Padded
    # columns produce exactly zero through bias/relu/matmul, so slicing back to
    # D_out is exact.
    def pad_cols(w):
        return jnp.pad(w, ((0, 0), (0, d_pad - D_out)))

    w_cat = jnp.concatenate([pad_cols(wa), pad_cols(wu)], axis=1)  # (D_in, 2dp)
    b_cat = jnp.concatenate([jnp.pad(ba, (0, d_pad - D_out)),
                             jnp.pad(bu, (0, d_pad - D_out))]
                            ).reshape(1, 2 * d_pad).astype(jnp.float32)
    if mxu_bf16:
        w_cat = w_cat.astype(jnp.bfloat16)   # narrow weight DMA, no in-kernel cast

    # ---- generation-aware VMEM planning -------------------------------------
    try:
        vmem_cap = int(getattr(pltpu.get_tpu_info(), "vmem_capacity_bytes",
                               64 * 1024 * 1024))
    except Exception:  # pragma: no cover - conservative fallback
        vmem_cap = 64 * 1024 * 1024
    # ~38 MiB of v7x's 64 MiB, ~77 MiB of v5e/v6e's 128 MiB.
    budget = min(int(0.6 * vmem_cap), 96 * 1024 * 1024)

    x_bytes, adj_bytes = x.dtype.itemsize, adj.dtype.itemsize
    w_bytes = w_cat.dtype.itemsize
    mxu_bytes = 2 if mxu_bf16 else 4

    def block_bytes(bt):
        io = (2 * bt * N * D_in * x_bytes                 # x, double-buffered
              + 2 * bt * N * N * adj_bytes                # adj, double-buffered
              + 2 * (D_in * 2 * d_pad + 2 * d_pad) * w_bytes
              + 2 * bt * N * out_cols * 4)                # out, double-buffered
        temps = (bt * N * D_in * mxu_bytes                # x MXU cast
                 + 2 * bt * N * 2 * d_pad * 4             # au + ax/ux slices
                 + bt * N * d_pad * (4 + mxu_bytes)       # scaled ax + MXU cast
                 + bt * N * N * mxu_bytes                 # adj MXU cast
                 + bt * N * d_pad * 4)                    # agg
        return int(1.2 * (io + temps))                    # 20% margin

    # Largest batch block within budget, capped so the grid keeps >= 2 steps
    # (v7x megacore sharding of the "parallel" axis + DMA/compute pipelining);
    # aim for >= 4 steps when B allows.
    min_grid = min(B, 4)
    bt_cap = max(1, _cdiv(B, min_grid))
    bt = 1
    for cand in range(bt_cap, 0, -1):
        if block_bytes(cand) <= budget:
            bt = cand
            break
    # TODO(synk): if block_bytes(1) > budget (very large N, esp. v7x's 64 MiB),
    # tile adjacency rows with a 2D grid (batch, row-tile) instead of one block.

    grid_b = _cdiv(B, bt)
    B_pad = grid_b * bt
    if B_pad != B:
        # Ragged batch: zero-pad so every block read is well-defined (zero adj
        # columns clamp to eps in the normalize; padded outputs are sliced off).
        x = jnp.pad(x, ((0, B_pad - B), (0, 0), (0, 0)))
        adj = jnp.pad(adj, ((0, B_pad - B), (0, 0), (0, 0)))

    vmem_limit = int(min(0.9 * vmem_cap,
                         max(2 * block_bytes(bt), 32 * 1024 * 1024)))

    kernel = functools.partial(_gconv_kernel, norm=norm, d_pad=d_pad,
                               out_cols=out_cols, mxu_bf16=mxu_bf16)

    out = pl.pallas_call(
        kernel,
        out_shape=jax.ShapeDtypeStruct((B_pad, N, out_cols), jnp.float32),
        grid_spec=pltpu.PrefetchScalarGridSpec(
            num_scalar_prefetch=0,
            grid=(grid_b,),
            in_specs=[
                pl.BlockSpec((bt, N, D_in), lambda i: (i, 0, 0)),       # x
                pl.BlockSpec((bt, N, N), lambda i: (i, 0, 0)),          # adj
                pl.BlockSpec((D_in, 2 * d_pad), lambda i: (0, 0)),      # [Wa|Wu]
                pl.BlockSpec((1, 2 * d_pad), lambda i: (0, 0)),         # [ba|bu]
            ],
            out_specs=pl.BlockSpec((bt, N, out_cols), lambda i: (i, 0, 0)),
        ),
        compiler_params=pltpu.CompilerParams(
            dimension_semantics=("parallel",),
            vmem_limit_bytes=vmem_limit),
    )(x, adj, w_cat, b_cat)

    if B_pad != B:
        out = out[:B]
    if out_cols != D_out:
        out = out[..., :D_out]
    return out


def gconv_reference(x, adj, wa, ba, wu, bu, norm: bool = True):
    """Pure-JAX reference matching the PyTorch module."""
    if norm:
        col_l1 = jnp.sum(jnp.abs(adj), axis=-2, keepdims=True)
        adj = adj / jnp.maximum(col_l1, 1e-12)
    ax = jax.nn.relu(jnp.einsum("bnd,de->bne", x, wa) + ba)
    ux = jax.nn.relu(jnp.einsum("bnd,de->bne", x, wu) + bu)
    return jnp.einsum("bnm,bme->bne", adj, ax) + ux


if __name__ == "__main__":
    key = jax.random.PRNGKey(0)
    B, N, D_in, D_out = 2, 16, 32, 32

    k_x, k_adj, k_wa, k_ba, k_wu, k_bu = jax.random.split(key, 6)

    x = jax.random.normal(k_x, (B, N, D_in), dtype=jnp.float32)
    # {0,1} adjacency matrix, like the module's docstring.
    adj = (jax.random.uniform(k_adj, (B, N, N)) > 0.5).astype(jnp.float32)

    # nn.Linear stores (out, in); we store the transpose (in, out).
    bound = 1.0 / jnp.sqrt(D_in)
    wa = jax.random.uniform(k_wa, (D_in, D_out), minval=-bound, maxval=bound)
    ba = jax.random.uniform(k_ba, (D_out,), minval=-bound, maxval=bound)
    wu = jax.random.uniform(k_wu, (D_in, D_out), minval=-bound, maxval=bound)
    bu = jax.random.uniform(k_bu, (D_out,), minval=-bound, maxval=bound)

    ref = gconv_reference(x, adj, wa, ba, wu, bu, norm=True)

    # f32 MXU operands: tight accuracy vs the f32 reference.
    out_f32 = jax.block_until_ready(
        gconv_forward(x, adj, wa, ba, wu, bu, norm=True, mxu_bf16=False))
    assert out_f32.shape == (B, N, D_out)
    assert jnp.allclose(out_f32, ref, atol=1e-5, rtol=1e-5), "f32 mismatch"

    # bf16 MXU operands (recommended perf mode): f32 accumulation; the {0,1}
    # adjacency cast is exact, x/weight casts are lossy.
    out_bf16 = jax.block_until_ready(
        gconv_forward(x, adj, wa, ba, wu, bu, norm=True, mxu_bf16=True))
    assert out_bf16.shape == (B, N, D_out)
    assert jnp.allclose(out_bf16, ref, atol=5e-2, rtol=5e-2), "bf16 mismatch"

    print("KERNEL_OK")
</pallas_src>

<mosaic_0001>
module attributes {stable_mosaic.version = 11 : i64} {
  func.func @_gconv_kernel(%arg0: i32, %arg1: memref<1x16x32xf32, #tpu.memory_space<vmem>>, %arg2: memref<1x16x16xf32, #tpu.memory_space<vmem>>, %arg3: memref<32x256xf32, #tpu.memory_space<vmem>>, %arg4: memref<1x256xf32, #tpu.memory_space<vmem>>, %arg5: memref<1x16x32xf32, #tpu.memory_space<vmem>>) attributes {dimension_semantics = [#tpu.dimension_semantics<parallel>], iteration_bounds = array<i64: 2>, scalar_prefetch = 0 : i64, scratch_operands = 0 : i64, tpu.core_type = #tpu.core_type<tc>, window_params = [{transform_indices = @transform_0, window_bounds = array<i64: 1, 16, 32>}, {transform_indices = @transform_1, window_bounds = array<i64: 1, 16, 16>}, {pipeline_mode = #tpu.pipeline_mode<synchronous>, transform_indices = @transform_2, window_bounds = array<i64: 32, 256>}, {pipeline_mode = #tpu.pipeline_mode<synchronous>, transform_indices = @transform_3, window_bounds = array<i64: 1, 256>}, {transform_indices = @transform_4, window_bounds = array<i64: 1, 16, 32>}]} {
    %c0 = arith.constant 0 : index
    %c0_0 = arith.constant 0 : index
    %0 = vector.load %arg3[%c0, %c0_0] : memref<32x256xf32, #tpu.memory_space<vmem>>, vector<32x256xf32>
    %c0_1 = arith.constant 0 : index
    %c0_2 = arith.constant 0 : index
    %1 = vector.load %arg4[%c0_1, %c0_2] : memref<1x256xf32, #tpu.memory_space<vmem>>, vector<1x256xf32>
    %c0_3 = arith.constant 0 : index
    %c0_4 = arith.constant 0 : index
    %c0_5 = arith.constant 0 : index
    %2 = vector.load %arg1[%c0_3, %c0_4, %c0_5] : memref<1x16x32xf32, #tpu.memory_space<vmem>>, vector<1x16x32xf32>
    %3 = vector.shape_cast %2 : vector<1x16x32xf32> to vector<16x32xf32>
    %cst = arith.constant dense<0.000000e+00> : vector<16x256xf32>
    %4 = tpu.matmul %3, %0, %cst {dimension_numbers = #tpu.dot_dimension_numbers<[1], [0], [0], [1], [0, 0, 1, 1], [], []>} : vector<16x32xf32>, vector<32x256xf32>, vector<16x256xf32> -> vector<16x256xf32>
    %5 = vector.broadcast %1 : vector<1x256xf32> to vector<16x256xf32>
    %6 = arith.addf %4, %5 : vector<16x256xf32>
    %cst_6 = arith.constant 0.000000e+00 : f32
    %7 = vector.broadcast %cst_6 : f32 to vector<16x256xf32>
    %8 = arith.maximumf %6, %7 : vector<16x256xf32>
    %9 = vector.shape_cast %8 : vector<16x256xf32> to vector<1x16x256xf32>
    %10 = vector.extract_strided_slice %9 {offsets = [0, 0, 0], sizes = [1, 16, 128], strides = [1, 1, 1]} : vector<1x16x256xf32> to vector<1x16x128xf32>
    %11 = vector.extract_strided_slice %9 {offsets = [0, 0, 128], sizes = [1, 16, 128], strides = [1, 1, 1]} : vector<1x16x256xf32> to vector<1x16x128xf32>
    %c0_7 = arith.constant 0 : index
    %c0_8 = arith.constant 0 : index
    %c0_9 = arith.constant 0 : index
    %12 = vector.load %arg2[%c0_7, %c0_8, %c0_9] : memref<1x16x16xf32, #tpu.memory_space<vmem>>, vector<1x16x16xf32>
    %13 = math.absf %12 : vector<1x16x16xf32>
    %cst_10 = arith.constant dense<0.000000e+00> : vector<1x16xf32>
    %14 = vector.multi_reduction <add>, %13, %cst_10 [1] : vector<1x16x16xf32> to vector<1x16xf32>
    %15 = vector.shape_cast %14 : vector<1x16xf32> to vector<1x1x16xf32>
    %cst_11 = arith.constant 9.99999996E-13 : f32
    %16 = vector.broadcast %cst_11 : f32 to vector<1x1x16xf32>
    %17 = arith.maximumf %15, %16 : vector<1x1x16xf32>
    %cst_12 = arith.constant 1.000000e+00 : f32
    %18 = vector.broadcast %cst_12 : f32 to vector<1x1x16xf32>
    %19 = arith.divf %18, %17 : vector<1x1x16xf32>
    %20 = tpu.transpose %19, [0, 2, 1] : vector<1x1x16xf32> -> vector<1x16x1xf32>
    %21 = vector.broadcast %20 : vector<1x16x1xf32> to vector<1x16x128xf32>
    %22 = arith.mulf %10, %21 : vector<1x16x128xf32>
    "tpu.trace_start"() <{level = 10 : i32, message = "bnm,bme->bne"}> : () -> ()
    %cst_13 = arith.constant dense<0.000000e+00> : vector<1x16x128xf32>
    %23 = tpu.matmul %12, %22, %cst_13 {dimension_numbers = #tpu.dot_dimension_numbers<[2], [1], [1], [2], [0, 0, 0, 1, 1, 2], [0], [0]>} : vector<1x16x16xf32>, vector<1x16x128xf32>, vector<1x16x128xf32> -> vector<1x16x128xf32>
    "tpu.trace_stop"() : () -> ()
    %24 = arith.addf %23, %11 : vector<1x16x128xf32>
    %25 = vector.extract_strided_slice %24 {offsets = [0, 0, 0], sizes = [1, 16, 32], strides = [1, 1, 1]} : vector<1x16x128xf32> to vector<1x16x32xf32>
    %c0_14 = arith.constant 0 : index
    %c0_15 = arith.constant 0 : index
    %c0_16 = arith.constant 0 : index
    %26 = vector.load %arg5[%c0_14, %c0_15, %c0_16] : memref<1x16x32xf32, #tpu.memory_space<vmem>>, vector<1x16x32xf32>
    tpu.vector_store %arg5[%c0_14, %c0_15, %c0_16], %25 {strides = array<i32>} : memref<1x16x32xf32, #tpu.memory_space<vmem>>, vector<1x16x32xf32>,
    return
  }
  func.func @transform_0(%arg0: i32) -> (i32, i32, i32) {
    %c0_i32 = arith.constant 0 : i32
    %c0_i32_0 = arith.constant 0 : i32
    %c0_i32_1 = arith.constant 0 : i32
    return %arg0, %c0_i32, %c0_i32_0 : i32, i32, i32
  }
  func.func @transform_1(%arg0: i32) -> (i32, i32, i32) {
    %c0_i32 = arith.constant 0 : i32
    %c0_i32_0 = arith.constant 0 : i32
    %c0_i32_1 = arith.constant 0 : i32
    return %arg0, %c0_i32, %c0_i32_0 : i32, i32, i32
  }
  func.func @transform_2(%arg0: i32) -> (i32, i32) {
    %c0_i32 = arith.constant 0 : i32
    %c0_i32_0 = arith.constant 0 : i32
    %c0_i32_1 = arith.constant 0 : i32
    return %c0_i32, %c0_i32_0 : i32, i32
  }
  func.func @transform_3(%arg0: i32) -> (i32, i32) {
    %c0_i32 = arith.constant 0 : i32
    %c0_i32_0 = arith.constant 0 : i32
    %c0_i32_1 = arith.constant 0 : i32
    return %c0_i32, %c0_i32_0 : i32, i32
  }
  func.func @transform_4(%arg0: i32) -> (i32, i32, i32) {
    %c0_i32 = arith.constant 0 : i32
    %c0_i32_0 = arith.constant 0 : i32
    %c0_i32_1 = arith.constant 0 : i32
    return %arg0, %c0_i32, %c0_i32_0 : i32, i32, i32
  }
}

</mosaic_0001>

<bundles_post_ra>
// kernel: tpu_custom_call.1
= control target key start
LH: loop header
LB: loop body
LE: loop exit
PB: predicated region body
PF: predicated region fallthrough
CT: control target
= control target key end

     0   :  { %s1246_s0 = inlined_call_operand.hbm [shape: f32[2,16,32], index: 0, kind: input, shape index: {}]   ;;  %s1247_s1 = inlined_call_operand.hbm [shape: f32[2,16,16], index: 1, kind: input, shape index: {}]   ;;  %s1248_s2 = inlined_call_operand.hbm [shape: f32[32,256], index: 2, kind: input, shape index: {}]   ;;  %s1249_s3 = inlined_call_operand.vmem [shape: f32[1,256], index: 3, kind: input, shape index: {}]   ;;  %s1250_s4 = inlined_call_operand.hbm [shape: f32[2,16,32], index: 4, kind: output, shape index: {}]  }
   0x1   :  { %1254 = sst [smem:[#allocation13_spill]] %s1246_s0 }
   0x2   :  { %9 = vsyncpa [#allocation3], 0 }
   0x3   :  { %11 = vsyncpa [#allocation3 + $0x1], 0 }
   0x4   :  { %12 = vsyncpa [#allocation6], 0 }
   0x5   :  { %14 = vsyncpa [#allocation6 + $0x1], 0 }
   0x6   :  { %15 = vsyncpa [#allocation4], 0 }
   0x7   :  { %17 = vsyncpa [#allocation4 + $0x1], 0  ;;  %s968_s15 = smov 0   ;;  %s970_s16 = smov 0  }
   0x8   :  { %s972_s17 = smov 0   ;;  %s974_s18 = smov 0  }
   0x9 LB: > { %s989_s19 = sadd.s32 4294967295, %s929_s18   ;;  %s643_s20 = sadd.s32 4294967294, %s929_s18   ;;  %s929_s18 = sphi %s974_s18, %s1272_s18   ;;  %s925_s17 = sphi %s972_s17, %s1271_s17   ;;  %s921_s16 = sphi %s970_s16, %s1270_s16   ;;  %s917_s15 = sphi %s968_s15, %s1269_s15  }
   0xa   : > { %p43_p0 = scmp.ne.s32.totalorder %s921_s16, %s917_s15  ;;  %p1251_p1 = scmp.eq.s32.totalorder %s989_s19, 0 }
   0xb   : > { %p141_p3 = scmp.eq.s32.totalorder %s643_s20, 1  ;;  %p644_p5 = scmp.ge.s32.totalorder %s929_s18, 1 }
   0xc   : > { %p998_p4 = por %p1251_p1, %p43_p0  ;;  %p148_p7 = scmp.lt.s32.totalorder %s929_s18, 3 }
   0xd   : > { %p1003_p6 = por %p141_p3, %p43_p0  ;;  %s931_s24 = smov [#allocation7]  }
   0xe   : > { %s1255_s21 = scalar_select %p998_p4, 1, 0 }
   0xf   : > { %s1256_s22 = scalar_select %p1003_p6, 1, 0 }
  0x10   : > { %p1008_p8 = pnand %p644_p5, %p148_p7  ;;  %s160_s25 = sshll.u32 %s931_s24, 4  ;;  %s1012_s25 = int_to_ptr.vmem [resolvable:$true] %s160_s25 }
  0x11   : > { %s1024_s27 = sadd.s32 1, %s929_s18   ;;  %s30_s28 = sadd.s32 1, %s925_s17 }
  0x12   : > { %s1257_s23 = scalar_select %p1008_p8, 1, 0 }
  0x13   : > { %p703_p9 = pneg %p1008_p8  ;;  %s27_s29 = ssub.s32 %s929_s18, %s1024_s27 }
  0x14   : > { %s767_s6 = scalar_lea.hbm %s1248_s2, 1024 }
  0x15   : > { %p1019_p11 = pnand %p703_p9, %p1251_p1  ;;  %p768_p12 = scmp.ne.s32.totalorder %s1248_s2, %s767_s6 }
  0x16   : > { %p774_p5 = scmp.lt.u32.totalorder %s767_s6, %s1248_s2 }
  0x17   : > { %p769_p13 = pneg %p1019_p11 }
  0x19   : > { %p770_p0 = pnand %p769_p13, %p768_p12 }
  0x1b   : > { %p771_p3 = pneg %p770_p0 }
  0x1d   : > { %p776_p7 = pnand %p774_p5, %p771_p3 }
  0x1f   : > { %779 = shalt.err (!%p776_p7)
}
  0x20   : > { %s780_s11 = scalar_lea.vmem %s1012_s25, 1024  ;;  %p788_p2 = scmp.lt.s32.totalorder %s1012_s25, %s1012_s25 }
  0x21   : > { %p781_p9 = scmp.ne.s32.totalorder %s1012_s25, %s780_s11  ;;  %p789_p6 = scmp.lt.s32.totalorder %s780_s11, %s780_s11 }
  0x23   : > { %p783_p10 = pnand %p781_p9, %p769_p13  ;;  %p790_p4 = por %p789_p6, %p788_p2 }
  0x25   : > { %p784_p1 = pneg %p783_p10 }
  0x27   : > { %p791_p8 = pnand %p790_p4, %p784_p1 }
  0x29   : > { %794 = shalt.err (!%p791_p8)
}
  0x2a   : > { %s932_s12 = smov 256   ;;  %s933_s13 = smov 16  }
  0x2b   : > { %706 = dma.hbm_to_vmem [thread:$0]  (!%p1019_p11), %s1248_s2, 1024, %s1012_s25, [#allocation6], %s932_s12, %s932_s12, %s933_s13  }
  0x2c   : > { %p28_p1 = scmp.eq.s32.totalorder %s27_s29, 0  ;;  %p37_p2 = scmp.ne.s32.totalorder %s925_s17, %s921_s16 }
  0x2d   : > { %p38_p4 = scmp.eq.s32.totalorder %s929_s18, 0  ;;  %p719_p6 = scmp.lt.s32.totalorder %s929_s18, 2 }
  0x2e   : > { %s1055_s24 = scalar_select %p28_p1, %s925_s17, %s30_s28  }
  0x2f   : > { %p39_p8 = por %p38_p4, %p37_p2  ;;  %p1259_p10 = scmp.eq.s32.totalorder %s989_s19, 1 }
  0x30   : > { %s177_s5 = sand.u32 1, %s925_s17   ;;  %s667_s6 = sshll.u32 %s929_s18, 8 }
  0x31   : > { %p1059_p12 = por %p1259_p10, %p37_p2  ;;  %s1065_s7 = sshll.u32 %s177_s5, 4 }
  0x32   : > { %s1261_s0 = sld [smem:[#allocation13_spill]]  ;;  %s181_s28 = scalar_lea.vmem [#allocation2], %s1065_s7 }
  0x33   : > { %s188_s29 = sshll.u32 %s181_s28, 4  ;;  %p1075_p11 = pnand %p719_p6, %p39_p8  ;;  %s1079_s29 = int_to_ptr.vmem [resolvable:$true] %s188_s29 }
  0x34   : > { %s1081_s10 = scalar_lea.sflag [#allocation3], %s177_s5 }
  0x35   : > { %p797_p0 = pneg %p1075_p11 }
  0x38   : > { %s1072_s25 = scalar_lea.hbm %s1261_s0, %s667_s6  ;;  %s800_s14 = scalar_lea.hbm %s1261_s0, 512 }
  0x39   : > { %s795_s11 = scalar_lea.hbm %s1072_s25, 256  ;;  %p801_p7 = scmp.lt.u32.totalorder %s1072_s25, %s1261_s0 }
  0x3a   : > { %p796_p13 = scmp.ne.s32.totalorder %s1072_s25, %s795_s11  ;;  %p802_p9 = scmp.lt.u32.totalorder %s800_s14, %s795_s11 }
  0x3b   : > { %p804_p2 = scmp.lt.u32.totalorder %s795_s11, %s1072_s25 }
  0x3c   : > { %p798_p3 = pnand %p797_p0, %p796_p13  ;;  %p803_p1 = por %p802_p9, %p801_p7 }
  0x3e   : > { %p799_p5 = pneg %p798_p3  ;;  %p805_p4 = por %p804_p2, %p803_p1 }
  0x40   : > { %p806_p6 = pnand %p805_p4, %p799_p5 }
  0x42   : > { %809 = shalt.err (!%p806_p6)
}
  0x43   : > { %s810_s5 = scalar_lea.vmem %s1079_s29, 256  ;;  %s934_s8 = smov [#allocation2]  }
  0x44   : > { %p811_p8 = scmp.ne.s32.totalorder %s1079_s29, %s810_s5  ;;  %s815_s28 = sshll.u32 %s934_s8, 4  ;;  %s816_s28 = int_to_ptr.vmem [resolvable:$false] %s815_s28 }
  0x45   : > { %s817_s12 = scalar_lea.vmem %s816_s28, 512  ;;  %p818_p3 = scmp.lt.s32.totalorder %s1079_s29, %s816_s28 }
  0x46   : > { %p813_p10 = pnand %p811_p8, %p797_p0  ;;  %p819_p7 = scmp.lt.s32.totalorder %s817_s12, %s810_s5 }
  0x48   : > { %p814_p13 = pneg %p813_p10  ;;  %p820_p9 = por %p819_p7, %p818_p3 }
  0x4a   : > { %p821_p1 = pnand %p820_p9, %p814_p13 }
  0x4c   : > { %824 = shalt.err (!%p821_p1)
}
  0x4d   : > { %s935_s11 = smov 128   ;;  %s936_s13 = smov 8  }
  0x4e   : > { %710 = dma.hbm_to_vmem [thread:$0]  (!%p1075_p11), %s1072_s25, 256, %s1079_s29, %s1081_s10, %s935_s11, %s935_s11, %s936_s13  }
  0x4f   : > { %s1117_s26 = scalar_lea.hbm %s1247_s1, %s667_s6  ;;  %s202_s5 = scalar_lea.vmem [#allocation5], %s1065_s7 }
  0x50   : > { %s209_s8 = sshll.u32 %s202_s5, 4  ;;  %s198_s28 = sand.u32 1, %s929_s18   ;;  %s1121_s8 = int_to_ptr.vmem [resolvable:$true] %s209_s8 }
  0x51   : > { %s1123_s12 = scalar_lea.sflag [#allocation6], %s198_s28  ;;  %s825_s0 = scalar_lea.hbm %s1117_s26, 256 }
  0x52   : > { %p826_p5 = scmp.ne.s32.totalorder %s1117_s26, %s825_s0  ;;  %s830_s29 = scalar_lea.hbm %s1247_s1, 512 }
  0x53   : > { %p831_p6 = scmp.lt.u32.totalorder %s1117_s26, %s1247_s1  ;;  %p832_p8 = scmp.lt.u32.totalorder %s830_s29, %s825_s0 }
  0x54   : > { %p828_p2 = pnand %p826_p5, %p797_p0  ;;  %p834_p13 = scmp.lt.u32.totalorder %s825_s0, %s1117_s26 }
  0x55   : > { %p833_p10 = por %p832_p8, %p831_p6 }
  0x56   : > { %p829_p4 = pneg %p828_p2 }
  0x57   : > { %p835_p3 = por %p834_p13, %p833_p10 }
  0x59   : > { %p836_p7 = pnand %p835_p3, %p829_p4 }
  0x5b   : > { %839 = shalt.err (!%p836_p7)
}
  0x5c   : > { %s840_s7 = scalar_lea.vmem %s1121_s8, 256  ;;  %s937_s20 = smov [#allocation5]  }
  0x5d   : > { %p841_p9 = scmp.ne.s32.totalorder %s1121_s8, %s840_s7  ;;  %s845_s5 = sshll.u32 %s937_s20, 4  ;;  %s846_s5 = int_to_ptr.vmem [resolvable:$false] %s845_s5 }
  0x5e   : > { %s847_s28 = scalar_lea.vmem %s846_s5, 512  ;;  %p848_p2 = scmp.lt.s32.totalorder %s1121_s8, %s846_s5 }
  0x5f   : > { %p843_p1 = pnand %p841_p9, %p797_p0  ;;  %p849_p6 = scmp.lt.s32.totalorder %s847_s28, %s840_s7 }
  0x61   : > { %p844_p5 = pneg %p843_p1  ;;  %p850_p8 = por %p849_p6, %p848_p2 }
  0x63   : > { %p851_p10 = pnand %p850_p8, %p844_p5 }
  0x65   : > { %854 = shalt.err (!%p851_p10)
}
  0x66   : > { %713 = dma.hbm_to_vmem [thread:$0]  (!%p1075_p11), %s1117_s26, 256, %s1121_s8, %s1123_s12, %s935_s11, %s935_s11, %s936_s13  }
  0x67   : > { %p1263_p0 = scmp.ne.s32.totalorder %s1257_s23, 0 }
  0x68   : > { %s1155_s0 = sand.u32 (!%p1263_p0), 1, %s921_s16   ;;  %p1264_p4 = scmp.ne.s32.totalorder (!%p1263_p0), %s1255_s21, 0 }
  0x69   : > { %221 = sbr.rel (%p1263_p0) target bundleno = 650 (0x28a), region = 36  ;;  %s1158_s25 = sshll.u32 (!%p1263_p0), %s1155_s0, 4 }
  0x6a   : > { %s224_s9 = scalar_lea.sflag (!%p1263_p0), [#allocation3], %s1155_s0  ;;  %s227_s6 = scalar_lea.vmem (!%p1263_p0), [#allocation2], %s1158_s25 }
  0x70   : > { %900 = dma.done.wait (%p1264_p4), %s224_s9, 256  }
  0x71   : > { %902 = vsyncadd (%p1264_p4), %s224_s9, 4294967040  ;;  %s232_s23 = sand.u32 1, %s989_s19   ;;  %s236_s13 = scalar_lea.vmem [#allocation5], %s1158_s25 }
  0x72   : > { %s233_s11 = scalar_lea.sflag [#allocation6], %s232_s23 }
  0x73   : > { %904 = dma.done.wait (%p1264_p4), %s233_s11, 256  }
  0x74   : > { %906 = vsyncadd (%p1264_p4), %s233_s11, 4294967040  ;;  %p1265_p11 = scmp.eq.s32.totalorder %s989_s19, 0 }
  0x76   : > { %908 = dma.done.wait (%p1265_p11), [#allocation6], 1024   ;;  %p1266_p13 = pmov %p1265_p11 }
  0x77   : > { %v938_v0 = vmov 0.0   ;;  %v939_v1 = vmov 0   ;;  %v380_v2 = vld [vmem:[%s236_s13] sm:$0xff]  ;;  %v1176_v3 = vld [vmem:[%s236_s13 + $0x8] sm:$0xff]  ;;  %vm384_vm0 = vcmask 130048   ;;  %vm292_vm1 = vcmask 261120  }
  0x78   : > { %910 = vsyncadd (%p1266_p13), [#allocation6], 4294966272  ;;  %363 = vmatprep.mubr.f32.mxu0 %v938_v0  ;;  %764 = vset.pattern.permute.xlu1 %v939_v1  ;;  %v271_v4 = vld [vmem:[#allocation7 + $0x8] sm:$0xff]  ;;  %v382_v5 = vand.u32 2147483647, %v380_v2  ;;  %v273_v7 = vld [vmem:[#allocation7 + $0x18] sm:$0xff]  ;;  %v282_v31 = vlaneseq }
  0x79   : > { %v383_v6 = vand.u32 2147483647, %v1176_v3  ;;  %v270_v8 = vld [vmem:[#allocation7] sm:$0xff]  ;;  %678 = vmatprep.mubr.msk.f32.mxu1 %vm384_vm0, %v380_v2  ;;  %v681_v9 = vpack.c.bf16 %v273_v7, %v271_v4  ;;  %v272_v10 = vld [vmem:[#allocation7 + $0x10] sm:$0xff]  ;;  %v275_v11 = vld [vmem:[#allocation7 + $0x28] sm:$0xff]  ;;  %s269_s8 = scalar_lea.vmem [#allocation8], %s1158_s25 }
  0x7a   : > { %v277_v12 = vld [vmem:[#allocation7 + $0x38] sm:$0xff]  ;;  %v385_v13 = vsel %vm384_vm0, %v382_v5, 0.0  ;;  %v683_v15 = vpack.c.bf16 %v272_v10, %v270_v8  ;;  %v274_v17 = vld [vmem:[#allocation7 + $0x20] sm:$0xff]  ;;  %v276_v18 = vld [vmem:[#allocation7 + $0x30] sm:$0xff]  ;;  %v283_v32 = vshrl.u32 %v282_v31, 7  ;;  %s538_s12 = sshll.u32 %s269_s8, 4  ;;  %s1195_s12 = int_to_ptr.vmem [resolvable:$true] %s538_s12 }
  0x7b   : > { %v386_v14 = vsel %vm384_vm0, %v383_v6, 0.0  ;;  %v685_v16 = vpack.c.bf16 %v277_v12, %v275_v11  ;;  %682 = vmatprep.subr.bf16.mxu0 %v681_v9  ;;  %v687_v20 = vpack.c.bf16 %v276_v18, %v274_v17  ;;  %v279_v23 = vld [vmem:[%s227_s6] sm:$0xff]  ;;  %v280_v26 = vld [vmem:[%s227_s6 + $0x8] sm:$0xff]  ;;  %s669_s29 = sshll.u32 %s989_s19, 8  ;;  %s525_s19 = scalar_lea.sflag [#allocation4], %s1155_s0 }
  0x7c   : > { %v387_v19 = vadd.f32 %v386_v14, %v385_v13  ;;  %684 = vmatpush1.bf16.msra.mxu0 %v683_v15  ;;  %v278_v33 = vld [vmem:[%s1249_s3] sm:$0x3]  ;;  %v288_v34 = vsub.s32 1, %v283_v32  ;;  %v284_v44 = vsub.s32 0, %v283_v32  ;;  %s1200_s7 = scalar_lea.hbm %s1250_s4, %s669_s29  ;;  %s855_s20 = scalar_lea.vmem %s1195_s12, 256 }
  0x7d   : > { %686 = vmatprep.subr.bf16.mxu0 %v685_v16  ;;  %p856_p3 = scmp.ne.s32.totalorder %s1195_s12, %s855_s20  ;;  %s940_s5 = smov [#allocation8]  }
  0x7e   : > { %v388_v21 = vrot.slane %v387_v19, 4  ;;  %v289_v35 = vrot.slane %v278_v33, %v288_v34  ;;  %v285_v45 = vrot.slane %v278_v33, %v284_v44  ;;  %s859_s28 = sshll.u32 %s940_s5, 4  ;;  %s860_s28 = int_to_ptr.vmem [resolvable:$false] %s859_s28 }
  0x7f   : > { %p857_p7 = pnand %p856_p3, %p1059_p12  ;;  %s861_s25 = scalar_lea.vmem %s860_s28, 512 }
  0x80   : > { %v389_v22 = vadd.f32 %v388_v21, %v387_v19  ;;  %688 = vmatpush1.bf16.msra.mxu0 %v687_v20  ;;  %p862_p1 = scmp.lt.s32.totalorder %s1195_s12, %s860_s28  ;;  %p863_p5 = scmp.lt.s32.totalorder %s861_s25, %s855_s20 }
  0x81   : > { %p858_p9 = pneg %p857_p7 }
  0x82   : > { %v390_v24 = vrot.slane %v389_v22, 2  ;;  %p864_p2 = por %p863_p5, %p862_p1 }
  0x83   : > { %658 = vmatmul.mubr.msk.f32.vlgmr.msra.gmra.mrb[0].mxu0 %vm292_vm1, %v279_v23 }
  0x84   : > { %v391_v25 = vadd.f32 %v390_v24, %v389_v22  ;;  %369 = vmatprep.mubr.f32.mxu0 %v938_v0  ;;  %p865_p6 = pnand %p864_p2, %p858_p9 }
  0x86   : > { %v392_v27 = vrot.slane %v391_v25, 1 }
  0x87   : > { %659 = vmatmul.mubr.msk.f32.gmra.mrb[2].mxu0 %vm292_vm1, %v280_v26 }
  0x88   : > { %v393_v28 = vadd.f32 %v392_v27, %v391_v25 }
  0x8a   : > { %v394_v29 = vmax.f32 %v393_v28, 1e-12 }
  0x8c   : > { %765 = vrcp.f32 %v394_v29 }
  0x96   : > { %v766_v30 = vpop.eup %765 }
  0x97   : > { %397 = vxpose.xlu0.b32.start.end [1/1] (short) (narrow) %v766_v30, 16 }
  0xc0   : > { %763 = vset.pattern.permute.xlu0 %v939_v1 }
 0x117   : > { %v413_v36 = vpop.trf.xlu0 }
 0x118   : > { %431 = vperm.xlu0 %763, %v413_v36  }
 0x11b   : > { %v414_v37 = vpop.trf.xlu0 }
 0x11c   : > { %436 = vperm.xlu1 %764, %v414_v37  }
 0x156   : > { %v365_v38 = vpop.f32.mrb[0].mxu0 }
 0x157   : > { %v367_v39 = vpop.f32.mrb[1].mxu0  ;;  %v366_v46 = vadd.f32 %v365_v38, %v285_v45 }
 0x158   : > { %v368_v40 = vadd.f32 %v367_v39, %v289_v35 }
 0x159   : > { %v376_v48 = vmax.f32 %v366_v46, 0.0 }
 0x15a   : > { %v371_v41 = vpop.f32.mrb[2].mxu0  ;;  %v377_v56 = vmax.f32 %v368_v40, 0.0 }
 0x15b   : > { %v373_v42 = vpop.f32.mrb[3].mxu0  ;;  %v372_v47 = vadd.f32 %v371_v41, %v285_v45 }
 0x15c   : > { %v374_v43 = vadd.f32 %v373_v42, %v289_v35 }
 0x15d   : > { %v378_v49 = vmax.f32 %v372_v47, 0.0 }
 0x15e   : > { %v379_v55 = vmax.f32 %v374_v43, 0.0 }
 0x197   : > { %v432_v50 = vpop.permute.xlu0 %431 }
 0x198   : > { %v439_v52 = vmul.f32 %v432_v50, %v376_v48 }
 0x19b   : > { %v437_v51 = vpop.permute.xlu1 %436 }
 0x19c   : > { %v440_v53 = vmul.f32 %v437_v51, %v378_v49 }
 0x19e   : > { %v689_v54 = vpack.c.bf16 %v440_v53, %v439_v52 }
 0x1a0   : > { %690 = vmatprep.subr.bf16.mxu1 %v689_v54 }
 0x1a1   : > { %692 = vmatpush3.bf16.msra.mxu1 %v689_v54 }
 0x1a4   : > { %679 = vmatmul.mubr.msk.f32.vlgmr.msra.gmra.mrb[0].mxu1 %vm384_vm0, %v1176_v3 }
 0x277   : > { %v680_v57 = vpop.f32.mrb[0].mxu1 }
 0x278   : > { %v519_v58 = vadd.f32 %v680_v57, %v379_v55  ;;  %v513_v59 = vpop.f32.mrb[1].mxu1 }
 0x279   : > { %v514_v60 = vadd.f32 %v513_v59, %v377_v56 }
 0x27a   : > { %523 = vst.msk [vmem:[%s269_s8 + $0x8] sm:$0xff] %vm292_vm1, %v519_v58 }
 0x27b   : > { %522 = vst.msk [vmem:[%s269_s8] sm:$0xff] %vm292_vm1, %v514_v60 }
 0x27c   : > { %868 = shalt.err (!%p865_p6)
}
 0x27d   : > { %s869_s9 = scalar_lea.hbm %s1200_s7, 256  ;;  %s873_s11 = scalar_lea.hbm %s1250_s4, 512 }
 0x27e   : > { %p870_p8 = scmp.ne.s32.totalorder %s1200_s7, %s869_s9  ;;  %p874_p4 = scmp.lt.u32.totalorder %s1200_s7, %s1250_s4 }
 0x27f   : > { %p875_p11 = scmp.lt.u32.totalorder %s873_s11, %s869_s9  ;;  %p877_p3 = scmp.lt.u32.totalorder %s869_s9, %s1200_s7 }
 0x280   : > { %p871_p10 = pnand %p870_p8, %p1059_p12 }
 0x281   : > { %p876_p13 = por %p875_p11, %p874_p4 }
 0x282   : > { %p872_p0 = pneg %p871_p10 }
 0x283   : > { %p878_p7 = por %p877_p3, %p876_p13 }
 0x285   : > { %p879_p9 = pnand %p878_p7, %p872_p0 }
 0x287   : > { %882 = shalt.err (!%p879_p9)
}
 0x288   : > { %s941_s26 = smov 128   ;;  %s942_s8 = smov 8  }
 0x289   : > { %701 = dma.vmem_to_hbm [thread:$0]  (%p1059_p12), %s1195_s12, 256, %s1200_s7, %s525_s19, %s941_s26, %s941_s26, %s942_s8  }
 0x28a PF: > { %s553_s29 = sand.u32 1, %s917_s15   ;;  %p1267_p1 = scmp.ne.s32.totalorder %s1256_s22, 0 }
 0x28b   : > { %p1268_p5 = scmp.ge.s32.totalorder %s929_s18, 2  ;;  %s554_s10 = scalar_lea.sflag [#allocation4], %s553_s29 }
 0x28d   : > { %p715_p2 = pnand %p1268_p5, %p1267_p1 }
 0x28f   : > { %912 = dma.done.wait (!%p715_p2), %s554_s10, 256  }
 0x290   : > { %914 = vsyncadd (!%p715_p2), %s554_s10, 4294967040  ;;  %p20_p6 = scmp.ge.s32.totalorder %s1024_s27, 4   ;;  %s1269_s15 = smov %s921_s16 }
 0x291   : > { %s1270_s16 = smov %s925_s17  ;;  %s1271_s17 = smov %s1055_s24 }
 0x292   : > { %s1272_s18 = smov %s1024_s27  ;;  %22 = sbr.rel (!%p20_p6) target bundleno = 9 (0x9), region = 98 }
 0x299   :  { %559 = vsyncpa [#allocation3], 1 }
 0x29a   :  { %561 = vsyncpa [#allocation3 + $0x1], 1 }
 0x29b   :  { %562 = vsyncpa [#allocation6], 1 }
 0x29c   :  { %564 = vsyncpa [#allocation6 + $0x1], 1 }
 0x29d   :  { %565 = vsyncpa [#allocation4], 1 }
 0x29e   :  { %567 = vsyncpa [#allocation4 + $0x1], 1 }

</bundles_post_ra>
